<compile_context>
chip_gen: v6e
topology: v6e:2x2x1
jax: 0.10.0
libtpu: 0.0.40
codegen_flags: <defaults>
</compile_context>

<pallas_src>
import jax
import jax.numpy as jnp
from jax.experimental import pallas as pl
from jax.experimental.pallas import tpu as pltpu


def _proj_relu_kernel(x_ref, w_ref, b_ref, o_ref):
    # x_ref: (n_blk, C_in, T)   w_ref: (C_out, C_in)   b_ref: (C_out, 1)
    # o_ref: (n_blk, C_out, T)
    w = w_ref[...]
    b = b_ref[...]
    # n_blk is a small static fold factor (<= 8): unrolled per-batch matmuls,
    # each (C_out, C_in) @ (C_in, T) -> (C_out, T), no in-kernel transposes.
    for n in range(x_ref.shape[0]):
        y = jnp.dot(w, x_ref[n], preferred_element_type=jnp.float32) + b
        o_ref[n] = jnp.maximum(y, 0.0).astype(o_ref.dtype)


# Per-step VMEM budget for the double-buffered x + out tiles (bytes).  Kept
# comfortably under the 32 MiB scoped-VMEM limit set below (safe on v5e's
# 16 MiB default once raised, v6e's 128 MiB physical and v7x's 64 MiB physical).
_VMEM_TILE_BUDGET = 20 * 1024 * 1024


def _pick_tiles(N, C_in, C_out, HW):
    """Choose (n_blk, T): batch fold factor and H*W lane tile."""
    # bytes per (n, lane) column, double-buffered input+output tiles, f32.
    bytes_per_col = 8 * (C_in + C_out)
    max_cols = max(1, _VMEM_TILE_BUDGET // bytes_per_col)      # n_blk * T budget
    t_cap = max(128, min(1024, (max_cols // 128) * 128))       # 512-1024 sweet spot

    if HW <= t_cap:
        T = HW                      # single full-extent tile (legal for any HW)
    else:
        T = t_cap                   # multiple of 128; cdiv grid clips the tail block

    n_blk = 1
    if T == HW and HW <= 512 and N > 1:
        # Tiny feature map: fold batch rows to amortize per-step overhead,
        # but keep >=2 grid steps along N so both v7x TensorCores get work.
        max_fold = max(1, max_cols // max(HW, 1))
        n_blk = max(1, min(N, 8, max_fold, (N + 1) // 2))
    return n_blk, T


def _conv1x1_relu(x, w, b, *, out_dtype=None):
    """x: (N, C_in, H, W); w: (C_out, C_in); b: (C_out,).

    Returns ReLU(conv1x1(x, w) + b) with shape (N, C_out, H, W)."""
    N, C_in, H, W = x.shape
    C_out = w.shape[0]
    HW = H * W
    out_dtype = x.dtype if out_dtype is None else out_dtype

    x2 = x.reshape(N, C_in, HW)
    b2 = b.reshape(C_out, 1)

    n_blk, T = _pick_tiles(N, C_in, C_out, HW)
    grid = (pl.cdiv(N, n_blk), pl.cdiv(HW, T))

    # Advisory cost hint: output-bandwidth bound (C_out typically >> C_in).
    out_itemsize = jnp.dtype(out_dtype).itemsize
    cost = pl.CostEstimate(
        flops=2 * N * C_out * C_in * HW,
        transcendentals=0,
        bytes_accessed=(4 * (N * C_in * HW + C_out * C_in + C_out)
                        + out_itemsize * N * C_out * HW),
    )

    out = pl.pallas_call(
        _proj_relu_kernel,
        out_shape=jax.ShapeDtypeStruct((N, C_out, HW), out_dtype),
        grid_spec=pltpu.PrefetchScalarGridSpec(
            num_scalar_prefetch=0,
            grid=grid,
            in_specs=[
                pl.BlockSpec((n_blk, C_in, T), lambda i, j: (i, 0, j)),
                pl.BlockSpec((C_out, C_in), lambda i, j: (0, 0)),
                pl.BlockSpec((C_out, 1), lambda i, j: (0, 0)),
            ],
            out_specs=pl.BlockSpec((n_blk, C_out, T), lambda i, j: (i, 0, j)),
        ),
        compiler_params=pltpu.CompilerParams(
            dimension_semantics=("parallel", "parallel"),
            # 32 MiB is safe on every generation (v5e default is only 16 MiB);
            # tiles are sized to ~20 MiB above so double-buffering always fits.
            vmem_limit_bytes=32 * 1024 * 1024,
        ),
        cost_estimate=cost,
    )(x2, w, b2)

    return out.reshape(N, C_out, H, W)


class ProjectionBlockPallas:
    """Pallas implementation of ProjectionBlock (1x1 conv + ReLU on tgt and ref)."""

    def __init__(self, in_dim, dim=256, get_ref=True, key=None, out_dtype=None):
        self.get_ref = get_ref
        self.dim = dim
        self.out_dtype = out_dtype  # None -> keep input dtype (f32, matches PyTorch)
        if key is None:
            key = jax.random.PRNGKey(0)
        k1, k2, k3, k4 = jax.random.split(key, 4)
        # Deterministic init matching nn.Conv2d parameter shapes:
        # weight: (dim, in_dim, 1, 1), bias: (dim,)
        scale = 1.0 / jnp.sqrt(in_dim)
        self.w_tgt = jax.random.uniform(k1, (dim, in_dim, 1, 1), jnp.float32, -scale, scale)
        self.b_tgt = jax.random.uniform(k2, (dim,), jnp.float32, -scale, scale)
        self._w2_tgt = self.w_tgt[:, :, 0, 0]
        if get_ref:
            self.w_ref = jax.random.uniform(k3, (dim, in_dim, 1, 1), jnp.float32, -scale, scale)
            self.b_ref = jax.random.uniform(k4, (dim,), jnp.float32, -scale, scale)
            self._w2_ref = self.w_ref[:, :, 0, 0]

    def __call__(self, tgt, ref=None):
        # Two separate pallas_calls (one per stream): avoids stacking inputs and
        # splitting a stacked output, which would cost an extra full-output HBM
        # round trip on this mem-bound op.
        tgt_out = _conv1x1_relu(tgt, self._w2_tgt, self.b_tgt, out_dtype=self.out_dtype)
        if self.get_ref:
            assert ref is not None
            ref_out = _conv1x1_relu(ref, self._w2_ref, self.b_ref, out_dtype=self.out_dtype)
            return tgt_out, ref_out
        return tgt_out


if __name__ == "__main__":
    key = jax.random.PRNGKey(0)
    k_tgt, k_ref, k_params = jax.random.split(key, 3)

    N, C_in, H, W = 2, 4, 16, 16
    dim = 256

    tgt = jax.random.normal(k_tgt, (N, C_in, H, W), jnp.float32)
    ref = jax.random.normal(k_ref, (N, C_in, H, W), jnp.float32)

    # Plain-JAX reference (1x1 conv == per-pixel channel matmul).
    def ref_fn(x, w, b):
        y = jnp.einsum("nchw,oc->nohw", x, w[:, :, 0, 0]) + b[None, :, None, None]
        return jnp.maximum(y, 0.0)

    # get_ref=True path.
    block = ProjectionBlockPallas(in_dim=C_in, dim=dim, get_ref=True, key=k_params)
    tgt_out, ref_out = block(tgt, ref)
    jax.block_until_ready((tgt_out, ref_out))

    exp_tgt = ref_fn(tgt, block.w_tgt, block.b_tgt)
    exp_ref = ref_fn(ref, block.w_ref, block.b_ref)
    assert tgt_out.shape == (N, dim, H, W) and ref_out.shape == (N, dim, H, W)
    assert jnp.allclose(tgt_out, exp_tgt, atol=1e-5)
    assert jnp.allclose(ref_out, exp_ref, atol=1e-5)

    # get_ref=False path.
    block_single = ProjectionBlockPallas(in_dim=C_in, dim=dim, get_ref=False, key=k_params)
    single_out = block_single(tgt)
    jax.block_until_ready(single_out)
    exp_single = ref_fn(tgt, block_single.w_tgt, block_single.b_tgt)
    assert single_out.shape == (N, dim, H, W)
    assert jnp.allclose(single_out, exp_single, atol=1e-5)

    print("KERNEL_OK")
</pallas_src>

<mosaic_0001>
module attributes {stable_mosaic.version = 11 : i64} {
  func.func @_proj_relu_kernel(%arg0: i32, %arg1: i32, %arg2: memref<1x4x256xf32, #tpu.memory_space<vmem>>, %arg3: memref<256x4xf32, #tpu.memory_space<vmem>>, %arg4: memref<256x1xf32, #tpu.memory_space<vmem>>, %arg5: memref<1x256x256xf32, #tpu.memory_space<vmem>>) attributes {dimension_semantics = [#tpu.dimension_semantics<parallel>, #tpu.dimension_semantics<parallel>], iteration_bounds = array<i64: 2, 1>, scalar_prefetch = 0 : i64, scratch_operands = 0 : i64, tpu.core_type = #tpu.core_type<tc>, window_params = [{transform_indices = @transform_0, window_bounds = array<i64: 1, 4, 256>}, {pipeline_mode = #tpu.pipeline_mode<synchronous>, transform_indices = @transform_1, window_bounds = array<i64: 256, 4>}, {pipeline_mode = #tpu.pipeline_mode<synchronous>, transform_indices = @transform_2, window_bounds = array<i64: 256, 1>}, {transform_indices = @transform_3, window_bounds = array<i64: 1, 256, 256>}]} {
    %c0 = arith.constant 0 : index
    %c0_0 = arith.constant 0 : index
    %0 = vector.load %arg3[%c0, %c0_0] : memref<256x4xf32, #tpu.memory_space<vmem>>, vector<256x4xf32>
    %c0_1 = arith.constant 0 : index
    %c0_2 = arith.constant 0 : index
    %1 = vector.load %arg4[%c0_1, %c0_2] : memref<256x1xf32, #tpu.memory_space<vmem>>, vector<256x1xf32>
    %c0_3 = arith.constant 0 : index
    %c0_4 = arith.constant 0 : index
    %c0_5 = arith.constant 0 : index
    %2 = vector.load %arg2[%c0_3, %c0_4, %c0_5] : memref<1x4x256xf32, #tpu.memory_space<vmem>>, vector<1x4x256xf32>
    %3 = vector.shape_cast %2 : vector<1x4x256xf32> to vector<4x256xf32>
    %cst = arith.constant dense<0.000000e+00> : vector<256x256xf32>
    %4 = tpu.matmul %0, %3, %cst {dimension_numbers = #tpu.dot_dimension_numbers<[1], [0], [0], [1], [0, 0, 1, 1], [], []>} : vector<256x4xf32>, vector<4x256xf32>, vector<256x256xf32> -> vector<256x256xf32>
    %5 = vector.broadcast %1 : vector<256x1xf32> to vector<256x256xf32>
    %6 = arith.addf %4, %5 : vector<256x256xf32>
    %cst_6 = arith.constant 0.000000e+00 : f32
    %7 = vector.broadcast %cst_6 : f32 to vector<256x256xf32>
    %8 = arith.maximumf %6, %7 : vector<256x256xf32>
    %c0_7 = arith.constant 0 : index
    %c0_8 = arith.constant 0 : index
    %c0_9 = arith.constant 0 : index
    %9 = vector.load %arg5[%c0_7, %c0_8, %c0_9] : memref<1x256x256xf32, #tpu.memory_space<vmem>>, vector<1x256x256xf32>
    %10 = vector.shape_cast %9 : vector<1x256x256xf32> to vector<256x256xf32>
    %11 = vector.shape_cast %8 : vector<256x256xf32> to vector<1x256x256xf32>
    tpu.vector_store %arg5[%c0_7, %c0_8, %c0_9], %11 {strides = array<i32>} : memref<1x256x256xf32, #tpu.memory_space<vmem>>, vector<1x256x256xf32>,
    return
  }
  func.func @transform_0(%arg0: i32, %arg1: i32) -> (i32, i32, i32) {
    %c0_i32 = arith.constant 0 : i32
    %c0_i32_0 = arith.constant 0 : i32
    return %arg0, %c0_i32, %arg1 : i32, i32, i32
  }
  func.func @transform_1(%arg0: i32, %arg1: i32) -> (i32, i32) {
    %c0_i32 = arith.constant 0 : i32
    %c0_i32_0 = arith.constant 0 : i32
    %c0_i32_1 = arith.constant 0 : i32
    return %c0_i32, %c0_i32_0 : i32, i32
  }
  func.func @transform_2(%arg0: i32, %arg1: i32) -> (i32, i32) {
    %c0_i32 = arith.constant 0 : i32
    %c0_i32_0 = arith.constant 0 : i32
    %c0_i32_1 = arith.constant 0 : i32
    return %c0_i32, %c0_i32_0 : i32, i32
  }
  func.func @transform_3(%arg0: i32, %arg1: i32) -> (i32, i32, i32) {
    %c0_i32 = arith.constant 0 : i32
    %c0_i32_0 = arith.constant 0 : i32
    return %arg0, %c0_i32, %arg1 : i32, i32, i32
  }
}

</mosaic_0001>

<bundles_post_ra>
// kernel: tpu_custom_call.1
= control target key start
LH: loop header
LB: loop body
LE: loop exit
PB: predicated region body
PF: predicated region fallthrough
CT: control target
= control target key end

     0   :  { %8 = vsyncpa [#allocation3], 0  ;;  %s1718_s0 = inlined_call_operand.vmem [shape: f32[2,4,256], index: 0, kind: input, shape index: {}]   ;;  %s1719_s1 = inlined_call_operand.vmem [shape: f32[256,4], index: 1, kind: input, shape index: {}]   ;;  %s1720_s2 = inlined_call_operand.vmem [shape: f32[256,1], index: 2, kind: input, shape index: {}]   ;;  %s1721_s3 = inlined_call_operand.hbm [shape: f32[2,256,256], index: 3, kind: output, shape index: {}]  }
   0x1   :  { %10 = vsyncpa [#allocation3 + $0x1], 0  ;;  %s1225_s12 = smov 0   ;;  %s1227_s13 = smov 0  }
   0x2   :  { %s1229_s14 = smov 0   ;;  %s1231_s15 = smov 0  }
   0x3   :  { %s1233_s16 = smov 0   ;;  %s1235_s17 = smov 0  }
   0x4 LB: > { %s1009_s18 = sadd.s32 4294967295, %s1198_s17   ;;  %s1010_s19 = sadd.s32 4294967294, %s1198_s17   ;;  %s1198_s17 = sphi %s1235_s17, %s16_s17   ;;  %s1194_s16 = sphi %s1233_s16, %s1728_s16   ;;  %s1190_s15 = sphi %s1231_s15, %s1727_s15   ;;  %s1186_s14 = sphi %s1229_s14, %s1726_s14   ;;  %s1182_s13 = sphi %s1227_s13, %s1725_s13   ;;  %s1178_s12 = sphi %s1225_s12, %s1724_s12  }
   0x5   : > { %s28_s20 = sadd.s32 1, %s1194_s16  ;;  %s107_s21 = sadd.s32 1, %s1186_s14 }
   0x6   : > { %p30_p0 = scmp.ge.s32.totalorder %s28_s20, 2  ;;  %p117_p1 = scmp.ne.s32.totalorder %s1186_s14, %s1182_s13 }
   0x7   : > { %p118_p2 = scmp.eq.s32.totalorder %s1009_s18, 1  ;;  %p123_p3 = scmp.ne.s32.totalorder %s1182_s13, %s1178_s12 }
   0x8   : > { %s1730_s20 = smov (%p30_p0, %s28_s20), 0  ;;  %p124_p5 = scmp.eq.s32.totalorder %s1010_s19, 1 }
   0x9   : > { %p1265_p4 = por %p118_p2, %p117_p1  ;;  %s102_s23 = ssub.s32 %s1194_s16, %s1730_s20 }
   0xa   : > { %p1013_p6 = scmp.ge.s32.totalorder %s1198_s17, 1  ;;  %p105_p7 = scmp.eq.s32.totalorder %s102_s23, 0 }
   0xb   : > { %p1272_p8 = por %p124_p5, %p123_p3  ;;  %p161_p9 = scmp.lt.s32.totalorder %s1198_s17, 3 }
   0xc   : > { %s1278_s25 = scalar_select %p105_p7, %s1186_s14, %s107_s21  }
   0xd   : > { %p162_p10 = pnand %p1013_p6, %p161_p9 }
   0xe   : > { %p190_p11 = scmp.lt.s32.totalorder (!%p162_p10), %s1190_s15, 1  ;;  %s186_s19 = sand.u32 (!%p162_p10), 1, %s1182_s13  }
   0xf   : > { %165 = sbr.rel (%p162_p10) target bundleno = 303 (0x12f), region = 32  ;;  %s1014_s21 = sshll.u32 (!%p162_p10), %s186_s19, 9 }
  0x10   : > { %s1570_s23 = scalar_lea.vmem (!%p162_p10), [#allocation2], %s1014_s21  ;;  %s1202_s5 = smov (!%p162_p10), [#allocation2]  }
  0x11   : > { %s930_s27 = sshll.u32 (!%p162_p10), %s1570_s23, 4  ;;  %s1126_s6 = sshll.u32 (!%p162_p10), %s1202_s5, 4  ;;  %s1665_s27 = int_to_ptr.vmem [resolvable:$true] %s930_s27  ;;  %s1127_s6 = int_to_ptr.vmem [resolvable:$false] %s1126_s6 }
  0x12   : > { %s1128_s7 = scalar_lea.vmem (!%p162_p10), %s1127_s6, 16384  ;;  %p1129_p1 = scmp.lt.s32.totalorder (!%p162_p10), %s1665_s27, %s1127_s6 }
  0x14   : > { %v1200_v0 = vmov 0.0   ;;  %s191_s26 = scalar_select %p190_p11, %s1190_s15, 1  ;;  %v1201_v1 = vmov 0   ;;  %v234_v2 = vld [vmem:[%s1720_s2 + $0x10] sm:$0xff]  ;;  %v232_v3 = vld [vmem:[%s1720_s2] sm:$0xff]  ;;  %v235_v4 = vld [vmem:[%s1720_s2 + $0x18] sm:$0xff] }
  0x15   : > { %593 = vmatprep.mubr.f32.mxu0 %v1200_v0  ;;  %689 = vmatprep.mubr.f32.mxu1 %v1200_v0  ;;  %v233_v5 = vld [vmem:[%s1720_s2 + $0x8] sm:$0xff]  ;;  %vm524_vm0 = vcmask 1043456   ;;  %v200_v8 = vld [vmem:[%s1719_s1] sm:$0xff]  ;;  %vm427_vm1 = vcmask 31744   ;;  %v239_v14 = vld [vmem:[%s1720_s2 + $0x38] sm:$0xff] }
  0x16   : > { %1120 = vset.pattern.permute.xlu1 %v1201_v1  ;;  %1119 = vset.pattern.permute.xlu0 %v1201_v1  ;;  %s1056_s4 = sshll.u32 %s191_s26, 3  ;;  %v216_v9 = vld [vmem:[%s1719_s1 + $0x80] sm:$0xff]  ;;  %v237_v10 = vld [vmem:[%s1720_s2 + $0x28] sm:$0xff]  ;;  %v238_v15 = vld [vmem:[%s1720_s2 + $0x30] sm:$0xff]  ;;  %s1057_s26 = sshll.u32 %s1190_s15, 13 }
  0x17   : > { %277 = vperm.xlu1 %1120, %v234_v2   ;;  %267 = vperm.xlu0 %1119, %v232_v3   ;;  %s197_s11 = scalar_lea.vmem %s1718_s0, %s1056_s4  ;;  %v236_v11 = vld [vmem:[%s1720_s2 + $0x20] sm:$0xff]  ;;  %v201_v12 = vld [vmem:[%s1719_s1 + $0x8] sm:$0xff]  ;;  %v202_v16 = vld [vmem:[%s1719_s1 + $0x10] sm:$0xff]  ;;  %s1663_s30 = scalar_lea.hbm %s1721_s3, %s1057_s26 }
  0x18   : > { %v264_v6 = vld [vmem:[%s197_s11] sm:$0xff]  ;;  %v217_v13 = vld [vmem:[%s1719_s1 + $0x88] sm:$0xff]  ;;  %v218_v17 = vld [vmem:[%s1719_s1 + $0x90] sm:$0xff]  ;;  %s1673_s15 = scalar_lea.sflag [#allocation3], %s186_s19  ;;  %s1122_s4 = scalar_lea.vmem %s1665_s27, 8192 }
  0x19   : > { %v426_v7 = vcombine.high %v264_v6, %v264_v6  ;;  %v241_v18 = vld [vmem:[%s1720_s2 + $0x48] sm:$0xff]  ;;  %v240_v19 = vld [vmem:[%s1720_s2 + $0x40] sm:$0xff]  ;;  %v203_v20 = vld [vmem:[%s1719_s1 + $0x18] sm:$0xff]  ;;  %p1123_p12 = scmp.ne.s32.totalorder %s1665_s27, %s1122_s4  ;;  %p1130_p2 = scmp.lt.s32.totalorder %s1128_s7, %s1122_s4 }
  0x1a   : > { %v219_v21 = vld [vmem:[%s1719_s1 + $0x98] sm:$0xff]  ;;  %v242_v23 = vld [vmem:[%s1720_s2 + $0x50] sm:$0xff]  ;;  %v204_v24 = vld [vmem:[%s1719_s1 + $0x20] sm:$0xff] }
  0x1b   : > { %282 = vperm.xlu1 %1120, %v235_v4   ;;  %272 = vperm.xlu0 %1119, %v233_v5   ;;  %v243_v22 = vld [vmem:[%s1720_s2 + $0x58] sm:$0xff]  ;;  %v220_v25 = vld [vmem:[%s1719_s1 + $0xa0] sm:$0xff]  ;;  %v245_v26 = vld [vmem:[%s1720_s2 + $0x68] sm:$0xff]  ;;  %p1124_p13 = pnand %p1123_p12, %p1265_p4  ;;  %p1131_p3 = por %p1130_p2, %p1129_p1 }
  0x1c   : > { %1017 = vmatprep.subr.msk.mxu0 %vm524_vm0, %v426_v7  ;;  %1058 = vmatprep.subr.msk.mxu1 %vm524_vm0, %v426_v7  ;;  %v244_v27 = vld [vmem:[%s1720_s2 + $0x60] sm:$0xff]  ;;  %v205_v28 = vld [vmem:[%s1719_s1 + $0x28] sm:$0xff]  ;;  %v247_v30 = vld [vmem:[%s1720_s2 + $0x78] sm:$0xff] }
  0x1d   : > { %1018 = vmatpush1.msk.msra.mxu0 %vm524_vm0, %v264_v6  ;;  %1059 = vmatpush1.msk.msra.mxu1 %vm524_vm0, %v264_v6  ;;  %v221_v29 = vld [vmem:[%s1719_s1 + $0xa8] sm:$0xff]  ;;  %v246_v31 = vld [vmem:[%s1720_s2 + $0x70] sm:$0xff]  ;;  %v248_v35 = vld [vmem:[%s1720_s2 + $0x80] sm:$0xff]  ;;  %p1125_p0 = pneg %p1124_p13 }
  0x1e   : > { %1019 = vmatmul.mubr.msk.f32.vlgmr.msra.gmra.mxu0 %vm427_vm1, %v200_v8  ;;  %1035 = vmatmul.mubr.msk.f32.vlgmr.msra.gmra.mxu1 %vm427_vm1, %v216_v9  ;;  %v206_v32 = vld [vmem:[%s1719_s1 + $0x30] sm:$0xff]  ;;  %v249_v34 = vld [vmem:[%s1720_s2 + $0x88] sm:$0xff]  ;;  %v207_v36 = vld [vmem:[%s1719_s1 + $0x38] sm:$0xff] }
  0x1f   : > { %599 = vmatprep.mubr.f32.mxu0 %v1200_v0  ;;  %695 = vmatprep.mubr.f32.mxu1 %v1200_v0  ;;  %v222_v33 = vld [vmem:[%s1719_s1 + $0xb0] sm:$0xff]  ;;  %v223_v37 = vld [vmem:[%s1719_s1 + $0xb8] sm:$0xff]  ;;  %v208_v40 = vld [vmem:[%s1719_s1 + $0x40] sm:$0xff]  ;;  %p1132_p5 = pnand %p1131_p3, %p1125_p0 }
  0x20   : > { %292 = vperm.xlu1 %1120, %v237_v10   ;;  %287 = vperm.xlu0 %1119, %v236_v11   ;;  %v251_v38 = vld [vmem:[%s1720_s2 + $0x98] sm:$0xff]  ;;  %v250_v39 = vld [vmem:[%s1720_s2 + $0x90] sm:$0xff]  ;;  %v224_v41 = vld [vmem:[%s1719_s1 + $0xc0] sm:$0xff] }
  0x21   : > { %v253_v42 = vld [vmem:[%s1720_s2 + $0xa8] sm:$0xff]  ;;  %v252_v43 = vld [vmem:[%s1720_s2 + $0xa0] sm:$0xff]  ;;  %v255_v46 = vld [vmem:[%s1720_s2 + $0xb8] sm:$0xff] }
  0x22   : > { %1020 = vmatmul.mubr.msk.f32.gmra.mxu0 %vm427_vm1, %v201_v12  ;;  %1036 = vmatmul.mubr.msk.f32.gmra.mxu1 %vm427_vm1, %v217_v13  ;;  %v209_v44 = vld [vmem:[%s1719_s1 + $0x48] sm:$0xff]  ;;  %v254_v47 = vld [vmem:[%s1720_s2 + $0xb0] sm:$0xff]  ;;  %v256_v51 = vld [vmem:[%s1720_s2 + $0xc0] sm:$0xff] }
  0x23   : > { %605 = vmatprep.mubr.f32.mxu0 %v1200_v0  ;;  %701 = vmatprep.mubr.f32.mxu1 %v1200_v0  ;;  %v225_v45 = vld [vmem:[%s1719_s1 + $0xc8] sm:$0xff]  ;;  %v210_v48 = vld [vmem:[%s1719_s1 + $0x50] sm:$0xff]  ;;  %v211_v52 = vld [vmem:[%s1719_s1 + $0x58] sm:$0xff] }
  0x24   : > { %302 = vperm.xlu1 %1120, %v239_v14   ;;  %297 = vperm.xlu0 %1119, %v238_v15   ;;  %v226_v49 = vld [vmem:[%s1719_s1 + $0xd0] sm:$0xff]  ;;  %v257_v50 = vld [vmem:[%s1720_s2 + $0xc8] sm:$0xff]  ;;  %v227_v53 = vld [vmem:[%s1719_s1 + $0xd8] sm:$0xff] }
  0x25   : > { %v259_v54 = vld [vmem:[%s1720_s2 + $0xd8] sm:$0xff]  ;;  %v258_v55 = vld [vmem:[%s1720_s2 + $0xd0] sm:$0xff]  ;;  %v212_v56 = vld [vmem:[%s1719_s1 + $0x60] sm:$0xff] }
  0x26   : > { %1021 = vmatmul.mubr.msk.f32.gmra.mxu0 %vm427_vm1, %v202_v16  ;;  %1037 = vmatmul.mubr.msk.f32.gmra.mxu1 %vm427_vm1, %v218_v17  ;;  %v228_v57 = vld [vmem:[%s1719_s1 + $0xe0] sm:$0xff]  ;;  %v261_v58 = vld [vmem:[%s1720_s2 + $0xe8] sm:$0xff]  ;;  %v263_v62 = vld [vmem:[%s1720_s2 + $0xf8] sm:$0xff] }
  0x27   : > { %611 = vmatprep.mubr.f32.mxu0 %v1200_v0  ;;  %707 = vmatprep.mubr.f32.mxu1 %v1200_v0  ;;  %v260_v59 = vld [vmem:[%s1720_s2 + $0xe0] sm:$0xff]  ;;  %v213_v60 = vld [vmem:[%s1719_s1 + $0x68] sm:$0xff]  ;;  %v262_v63 = vld [vmem:[%s1720_s2 + $0xf0] sm:$0xff] }
  0x28   : > { %312 = vperm.xlu1 %1120, %v241_v18   ;;  %307 = vperm.xlu0 %1119, %v240_v19   ;;  %v229_v61 = vld [vmem:[%s1719_s1 + $0xe8] sm:$0xff]  ;;  %v214_v1 = vld [vmem:[%s1719_s1 + $0x70] sm:$0xff]  ;;  %v215_v3 = vld [vmem:[%s1719_s1 + $0x78] sm:$0xff] }
  0x29   : > { %v230_v2 = vld [vmem:[%s1719_s1 + $0xf0] sm:$0xff]  ;;  %v231_v4 = vld [vmem:[%s1719_s1 + $0xf8] sm:$0xff] }
  0x2a   : > { %1022 = vmatmul.mubr.msk.f32.gmra.mxu0 %vm427_vm1, %v203_v20  ;;  %1038 = vmatmul.mubr.msk.f32.gmra.mxu1 %vm427_vm1, %v219_v21 }
  0x2b   : > { %617 = vmatprep.mubr.f32.mxu0 %v1200_v0  ;;  %713 = vmatprep.mubr.f32.mxu1 %v1200_v0 }
  0x2c   : > { %322 = vperm.xlu1 %1120, %v243_v22   ;;  %317 = vperm.xlu0 %1119, %v242_v23  }
  0x2e   : > { %1023 = vmatmul.mubr.msk.f32.gmra.mxu0 %vm427_vm1, %v204_v24  ;;  %1039 = vmatmul.mubr.msk.f32.gmra.mxu1 %vm427_vm1, %v220_v25 }
  0x2f   : > { %623 = vmatprep.mubr.f32.mxu0 %v1200_v0  ;;  %719 = vmatprep.mubr.f32.mxu1 %v1200_v0 }
  0x30   : > { %332 = vperm.xlu1 %1120, %v245_v26   ;;  %327 = vperm.xlu0 %1119, %v244_v27  }
  0x32   : > { %1024 = vmatmul.mubr.msk.f32.gmra.mxu0 %vm427_vm1, %v205_v28  ;;  %1040 = vmatmul.mubr.msk.f32.gmra.mxu1 %vm427_vm1, %v221_v29 }
  0x33   : > { %629 = vmatprep.mubr.f32.mxu0 %v1200_v0  ;;  %725 = vmatprep.mubr.f32.mxu1 %v1200_v0 }
  0x34   : > { %342 = vperm.xlu1 %1120, %v247_v30   ;;  %337 = vperm.xlu0 %1119, %v246_v31  }
  0x36   : > { %1025 = vmatmul.mubr.msk.f32.gmra.mxu0 %vm427_vm1, %v206_v32  ;;  %1041 = vmatmul.mubr.msk.f32.gmra.mxu1 %vm427_vm1, %v222_v33 }
  0x37   : > { %635 = vmatprep.mubr.f32.mxu0 %v1200_v0  ;;  %731 = vmatprep.mubr.f32.mxu1 %v1200_v0 }
  0x38   : > { %352 = vperm.xlu1 %1120, %v249_v34   ;;  %347 = vperm.xlu0 %1119, %v248_v35  }
  0x3a   : > { %1026 = vmatmul.mubr.msk.f32.gmra.mxu0 %vm427_vm1, %v207_v36  ;;  %1042 = vmatmul.mubr.msk.f32.gmra.mxu1 %vm427_vm1, %v223_v37 }
  0x3b   : > { %641 = vmatprep.mubr.f32.mxu0 %v1200_v0  ;;  %737 = vmatprep.mubr.f32.mxu1 %v1200_v0 }
  0x3c   : > { %362 = vperm.xlu1 %1120, %v251_v38   ;;  %357 = vperm.xlu0 %1119, %v250_v39  }
  0x3e   : > { %1027 = vmatmul.mubr.msk.f32.gmra.mxu0 %vm427_vm1, %v208_v40  ;;  %1043 = vmatmul.mubr.msk.f32.gmra.mxu1 %vm427_vm1, %v224_v41 }
  0x3f   : > { %647 = vmatprep.mubr.f32.mxu0 %v1200_v0  ;;  %743 = vmatprep.mubr.f32.mxu1 %v1200_v0 }
  0x40   : > { %372 = vperm.xlu1 %1120, %v253_v42   ;;  %367 = vperm.xlu0 %1119, %v252_v43  }
  0x42   : > { %1028 = vmatmul.mubr.msk.f32.gmra.mxu0 %vm427_vm1, %v209_v44  ;;  %1044 = vmatmul.mubr.msk.f32.gmra.mxu1 %vm427_vm1, %v225_v45 }
  0x43   : > { %653 = vmatprep.mubr.f32.mxu0 %v1200_v0  ;;  %749 = vmatprep.mubr.f32.mxu1 %v1200_v0 }
  0x44   : > { %382 = vperm.xlu1 %1120, %v255_v46   ;;  %377 = vperm.xlu0 %1119, %v254_v47  }
  0x46   : > { %1029 = vmatmul.mubr.msk.f32.gmra.mxu0 %vm427_vm1, %v210_v48  ;;  %1045 = vmatmul.mubr.msk.f32.gmra.mxu1 %vm427_vm1, %v226_v49 }
  0x47   : > { %659 = vmatprep.mubr.f32.mxu0 %v1200_v0  ;;  %755 = vmatprep.mubr.f32.mxu1 %v1200_v0 }
  0x48   : > { %392 = vperm.xlu1 %1120, %v257_v50   ;;  %387 = vperm.xlu0 %1119, %v256_v51  }
  0x4a   : > { %1030 = vmatmul.mubr.msk.f32.gmra.mxu0 %vm427_vm1, %v211_v52  ;;  %1046 = vmatmul.mubr.msk.f32.gmra.mxu1 %vm427_vm1, %v227_v53 }
  0x4b   : > { %665 = vmatprep.mubr.f32.mxu0 %v1200_v0  ;;  %761 = vmatprep.mubr.f32.mxu1 %v1200_v0 }
  0x4c   : > { %402 = vperm.xlu1 %1120, %v259_v54   ;;  %397 = vperm.xlu0 %1119, %v258_v55  }
  0x4e   : > { %1031 = vmatmul.mubr.msk.f32.gmra.mxu0 %vm427_vm1, %v212_v56  ;;  %1047 = vmatmul.mubr.msk.f32.gmra.mxu1 %vm427_vm1, %v228_v57 }
  0x4f   : > { %671 = vmatprep.mubr.f32.mxu0 %v1200_v0  ;;  %767 = vmatprep.mubr.f32.mxu1 %v1200_v0 }
  0x50   : > { %412 = vperm.xlu1 %1120, %v261_v58   ;;  %407 = vperm.xlu0 %1119, %v260_v59  }
  0x52   : > { %1032 = vmatmul.mubr.msk.f32.gmra.mxu0 %vm427_vm1, %v213_v60  ;;  %1048 = vmatmul.mubr.msk.f32.gmra.mxu1 %vm427_vm1, %v229_v61 }
  0x53   : > { %677 = vmatprep.mubr.f32.mxu0 %v1200_v0  ;;  %773 = vmatprep.mubr.f32.mxu1 %v1200_v0 }
  0x54   : > { %422 = vperm.xlu1 %1120, %v263_v62   ;;  %417 = vperm.xlu0 %1119, %v262_v63  }
  0x56   : > { %1033 = vmatmul.mubr.msk.f32.gmra.mxu0 %vm427_vm1, %v214_v1  ;;  %1049 = vmatmul.mubr.msk.f32.gmra.mxu1 %vm427_vm1, %v230_v2 }
  0x57   : > { %683 = vmatprep.mubr.f32.mxu0 %v1200_v0  ;;  %779 = vmatprep.mubr.f32.mxu1 %v1200_v0 }
  0x5a   : > { %1034 = vmatmul.mubr.msk.f32.gmra.mxu0 %vm427_vm1, %v215_v3  ;;  %1050 = vmatmul.mubr.msk.f32.gmra.mxu1 %vm427_vm1, %v231_v4 }
  0x92   : > { %v268_v5 = vpop.permute.xlu0 %267  ;;  %v278_v6 = vpop.permute.xlu1 %277 }
  0x96   : > { %v273_v7 = vpop.permute.xlu0 %272  ;;  %v1541_v8 = vpop.permute.xlu1 %282 }
  0x9b   : > { %v1543_v0 = vpop.permute.xlu0 %287  ;;  %v1545_v9 = vpop.permute.xlu1 %292 }
  0x9f   : > { %v1547_v10 = vpop.permute.xlu0 %297  ;;  %v1549_v11 = vpop.permute.xlu1 %302 }
  0xa3   : > { %v1551_v12 = vpop.permute.xlu0 %307  ;;  %v1553_v13 = vpop.permute.xlu1 %312 }
  0xa7   : > { %v1555_v14 = vpop.permute.xlu0 %317  ;;  %v1557_v15 = vpop.permute.xlu1 %322 }
  0xab   : > { %v1559_v16 = vpop.permute.xlu0 %327  ;;  %v1561_v17 = vpop.permute.xlu1 %332 }
  0xaf   : > { %v1563_v18 = vpop.permute.xlu0 %337  ;;  %v1566_v19 = vpop.permute.xlu1 %342 }
  0xb3   : > { %v348_v20 = vpop.permute.xlu0 %347  ;;  %v353_v27 = vpop.permute.xlu1 %352 }
  0xb7   : > { %v358_v40 = vpop.permute.xlu0 %357  ;;  %v363_v53 = vpop.permute.xlu1 %362 }
  0xbb   : > { %v368_v3 = vpop.permute.xlu0 %367 }
  0xde   : > { %v595_v21 = vpop.f32.mrf.mxu0  ;;  %v691_v22 = vpop.f32.mrf.mxu1 }
  0xdf   : > { %v596_v23 = vadd.f32 %v595_v21, %v268_v5  ;;  %v692_v24 = vadd.f32 %v691_v22, %v348_v20 }
  0xe0   : > { %v597_v25 = vpop.f32.mrf.mxu0  ;;  %v693_v26 = vpop.f32.mrf.mxu1 }
  0xe1   : > { %v786_v28 = vmax.f32 %v596_v23, 0.0  ;;  %v818_v29 = vmax.f32 %v692_v24, 0.0  ;;  %v598_v30 = vadd.f32 %v597_v25, %v268_v5  ;;  %v694_v31 = vadd.f32 %v693_v26, %v348_v20 }
  0xe2   : > { %v601_v32 = vpop.f32.mrf.mxu0  ;;  %v697_v33 = vpop.f32.mrf.mxu1 }
  0xe3   : > { %850 = vst [vmem:[%s1570_s23] sm:$0xff] %v786_v28  ;;  %882 = vst [vmem:[%s1570_s23 + $0x100] sm:$0xff] %v818_v29  ;;  %v787_v34 = vmax.f32 %v598_v30, 0.0  ;;  %v819_v35 = vmax.f32 %v694_v31, 0.0  ;;  %v602_v36 = vadd.f32 %v601_v32, %v273_v7  ;;  %v698_v37 = vadd.f32 %v697_v33, %v353_v27  ;;  %v373_v28 = vpop.permute.xlu1 %372 }
  0xe4   : > { %v603_v38 = vpop.f32.mrf.mxu0  ;;  %v699_v39 = vpop.f32.mrf.mxu1 }
  0xe5   : > { %851 = vst [vmem:[%s1570_s23 + $0x8] sm:$0xff] %v787_v34  ;;  %883 = vst [vmem:[%s1570_s23 + $0x108] sm:$0xff] %v819_v35  ;;  %v788_v41 = vmax.f32 %v602_v36, 0.0  ;;  %v820_v42 = vmax.f32 %v698_v37, 0.0  ;;  %v604_v43 = vadd.f32 %v603_v38, %v273_v7  ;;  %v700_v44 = vadd.f32 %v699_v39, %v353_v27 }
  0xe6   : > { %v607_v45 = vpop.f32.mrf.mxu0  ;;  %v703_v46 = vpop.f32.mrf.mxu1 }
  0xe7   : > { %852 = vst [vmem:[%s1570_s23 + $0x10] sm:$0xff] %v788_v41  ;;  %884 = vst [vmem:[%s1570_s23 + $0x110] sm:$0xff] %v820_v42  ;;  %v789_v47 = vmax.f32 %v604_v43, 0.0  ;;  %v821_v48 = vmax.f32 %v700_v44, 0.0  ;;  %v608_v49 = vadd.f32 %v607_v45, %v278_v6  ;;  %v704_v50 = vadd.f32 %v703_v46, %v358_v40 }
  0xe8   : > { %v609_v51 = vpop.f32.mrf.mxu0  ;;  %v705_v52 = vpop.f32.mrf.mxu1 }
  0xe9   : > { %853 = vst [vmem:[%s1570_s23 + $0x18] sm:$0xff] %v789_v47  ;;  %885 = vst [vmem:[%s1570_s23 + $0x118] sm:$0xff] %v821_v48  ;;  %v790_v54 = vmax.f32 %v608_v49, 0.0  ;;  %v822_v55 = vmax.f32 %v704_v50, 0.0  ;;  %v610_v56 = vadd.f32 %v609_v51, %v278_v6  ;;  %v706_v57 = vadd.f32 %v705_v52, %v358_v40  ;;  %v378_v40 = vpop.permute.xlu0 %377  ;;  %v383_v52 = vpop.permute.xlu1 %382 }
  0xea   : > { %v613_v58 = vpop.f32.mrf.mxu0  ;;  %v709_v59 = vpop.f32.mrf.mxu1 }
  0xeb   : > { %854 = vst [vmem:[%s1570_s23 + $0x20] sm:$0xff] %v790_v54  ;;  %886 = vst [vmem:[%s1570_s23 + $0x120] sm:$0xff] %v822_v55  ;;  %v791_v60 = vmax.f32 %v610_v56, 0.0  ;;  %v823_v61 = vmax.f32 %v706_v57, 0.0  ;;  %v614_v62 = vadd.f32 %v613_v58, %v1541_v8  ;;  %v710_v63 = vadd.f32 %v709_v59, %v363_v53 }
  0xec   : > { %v615_v1 = vpop.f32.mrf.mxu0  ;;  %v711_v2 = vpop.f32.mrf.mxu1 }
  0xed   : > { %855 = vst [vmem:[%s1570_s23 + $0x28] sm:$0xff] %v791_v60  ;;  %887 = vst [vmem:[%s1570_s23 + $0x128] sm:$0xff] %v823_v61  ;;  %v792_v4 = vmax.f32 %v614_v62, 0.0  ;;  %v824_v5 = vmax.f32 %v710_v63, 0.0  ;;  %v616_v6 = vadd.f32 %v615_v1, %v1541_v8  ;;  %v712_v7 = vadd.f32 %v711_v2, %v363_v53  ;;  %v388_v1 = vpop.permute.xlu0 %387 }
  0xee   : > { %v619_v20 = vpop.f32.mrf.mxu0  ;;  %v715_v21 = vpop.f32.mrf.mxu1 }
  0xef   : > { %856 = vst [vmem:[%s1570_s23 + $0x30] sm:$0xff] %v792_v4  ;;  %888 = vst [vmem:[%s1570_s23 + $0x130] sm:$0xff] %v824_v5  ;;  %v793_v22 = vmax.f32 %v616_v6, 0.0  ;;  %v825_v23 = vmax.f32 %v712_v7, 0.0  ;;  %v620_v24 = vadd.f32 %v619_v20, %v1543_v0  ;;  %v716_v25 = vadd.f32 %v715_v21, %v368_v3 }
  0xf0   : > { %v621_v26 = vpop.f32.mrf.mxu0  ;;  %v717_v27 = vpop.f32.mrf.mxu1 }
  0xf1   : > { %857 = vst [vmem:[%s1570_s23 + $0x38] sm:$0xff] %v793_v22  ;;  %889 = vst [vmem:[%s1570_s23 + $0x138] sm:$0xff] %v825_v23  ;;  %v794_v29 = vmax.f32 %v620_v24, 0.0  ;;  %v826_v8 = vmax.f32 %v716_v25, 0.0  ;;  %v622_v30 = vadd.f32 %v621_v26, %v1543_v0  ;;  %v718_v31 = vadd.f32 %v717_v27, %v368_v3  ;;  %v393_v25 = vpop.permute.xlu1 %392 }
  0xf2   : > { %v625_v32 = vpop.f32.mrf.mxu0  ;;  %v721_v33 = vpop.f32.mrf.mxu1 }
  0xf3   : > { %858 = vst [vmem:[%s1570_s23 + $0x40] sm:$0xff] %v794_v29  ;;  %890 = vst [vmem:[%s1570_s23 + $0x140] sm:$0xff] %v826_v8  ;;  %v795_v34 = vmax.f32 %v622_v30, 0.0  ;;  %v827_v35 = vmax.f32 %v718_v31, 0.0  ;;  %v626_v36 = vadd.f32 %v625_v32, %v1545_v9  ;;  %v722_v37 = vadd.f32 %v721_v33, %v373_v28 }
  0xf4   : > { %v627_v38 = vpop.f32.mrf.mxu0  ;;  %v723_v39 = vpop.f32.mrf.mxu1 }
  0xf5   : > { %859 = vst [vmem:[%s1570_s23 + $0x48] sm:$0xff] %v795_v34  ;;  %891 = vst [vmem:[%s1570_s23 + $0x148] sm:$0xff] %v827_v35  ;;  %v796_v41 = vmax.f32 %v626_v36, 0.0  ;;  %v828_v0 = vmax.f32 %v722_v37, 0.0  ;;  %v628_v42 = vadd.f32 %v627_v38, %v1545_v9  ;;  %v724_v43 = vadd.f32 %v723_v39, %v373_v28  ;;  %v398_v36 = vpop.permute.xlu0 %397 }
  0xf6   : > { %v631_v44 = vpop.f32.mrf.mxu0  ;;  %v727_v45 = vpop.f32.mrf.mxu1 }
  0xf7   : > { %860 = vst [vmem:[%s1570_s23 + $0x50] sm:$0xff] %v796_v41  ;;  %892 = vst [vmem:[%s1570_s23 + $0x150] sm:$0xff] %v828_v0  ;;  %v797_v46 = vmax.f32 %v628_v42, 0.0  ;;  %v829_v47 = vmax.f32 %v724_v43, 0.0  ;;  %v632_v48 = vadd.f32 %v631_v44, %v1547_v10  ;;  %v728_v49 = vadd.f32 %v727_v45, %v378_v40 }
  0xf8   : > { %v633_v50 = vpop.f32.mrf.mxu0  ;;  %v729_v51 = vpop.f32.mrf.mxu1 }
  0xf9   : > { %861 = vst [vmem:[%s1570_s23 + $0x58] sm:$0xff] %v797_v46  ;;  %893 = vst [vmem:[%s1570_s23 + $0x158] sm:$0xff] %v829_v47  ;;  %v798_v53 = vmax.f32 %v632_v48, 0.0  ;;  %v830_v9 = vmax.f32 %v728_v49, 0.0  ;;  %v634_v54 = vadd.f32 %v633_v50, %v1547_v10  ;;  %v730_v55 = vadd.f32 %v729_v51, %v378_v40  ;;  %v403_v47 = vpop.permute.xlu1 %402 }
  0xfa   : > { %v637_v56 = vpop.f32.mrf.mxu0  ;;  %v733_v57 = vpop.f32.mrf.mxu1 }
  0xfb   : > { %862 = vst [vmem:[%s1570_s23 + $0x60] sm:$0xff] %v798_v53  ;;  %894 = vst [vmem:[%s1570_s23 + $0x160] sm:$0xff] %v830_v9  ;;  %v799_v58 = vmax.f32 %v634_v54, 0.0  ;;  %v831_v59 = vmax.f32 %v730_v55, 0.0  ;;  %v638_v60 = vadd.f32 %v637_v56, %v1549_v11  ;;  %v734_v61 = vadd.f32 %v733_v57, %v383_v52 }
  0xfc   : > { %v639_v62 = vpop.f32.mrf.mxu0  ;;  %v735_v63 = vpop.f32.mrf.mxu1 }
  0xfd   : > { %863 = vst [vmem:[%s1570_s23 + $0x68] sm:$0xff] %v799_v58  ;;  %895 = vst [vmem:[%s1570_s23 + $0x168] sm:$0xff] %v831_v59  ;;  %v800_v2 = vmax.f32 %v638_v60, 0.0  ;;  %v832_v10 = vmax.f32 %v734_v61, 0.0  ;;  %v640_v3 = vadd.f32 %v639_v62, %v1549_v11  ;;  %v736_v4 = vadd.f32 %v735_v63, %v383_v52  ;;  %v408_v58 = vpop.permute.xlu0 %407 }
  0xfe   : > { %v643_v5 = vpop.f32.mrf.mxu0  ;;  %v739_v6 = vpop.f32.mrf.mxu1 }
  0xff   : > { %864 = vst [vmem:[%s1570_s23 + $0x70] sm:$0xff] %v800_v2  ;;  %896 = vst [vmem:[%s1570_s23 + $0x170] sm:$0xff] %v832_v10  ;;  %v801_v7 = vmax.f32 %v640_v3, 0.0  ;;  %v833_v20 = vmax.f32 %v736_v4, 0.0  ;;  %v644_v21 = vadd.f32 %v643_v5, %v1551_v12  ;;  %v740_v22 = vadd.f32 %v739_v6, %v388_v1  ;;  %v413_v6 = vpop.permute.xlu1 %412 }
 0x100   : > { %v645_v23 = vpop.f32.mrf.mxu0  ;;  %v741_v24 = vpop.f32.mrf.mxu1 }
 0x101   : > { %865 = vst [vmem:[%s1570_s23 + $0x78] sm:$0xff] %v801_v7  ;;  %897 = vst [vmem:[%s1570_s23 + $0x178] sm:$0xff] %v833_v20  ;;  %v802_v26 = vmax.f32 %v644_v21, 0.0  ;;  %v834_v11 = vmax.f32 %v740_v22, 0.0  ;;  %v646_v27 = vadd.f32 %v645_v23, %v1551_v12  ;;  %v742_v28 = vadd.f32 %v741_v24, %v388_v1 }
 0x102   : > { %v649_v29 = vpop.f32.mrf.mxu0  ;;  %v745_v8 = vpop.f32.mrf.mxu1 }
 0x103   : > { %866 = vst [vmem:[%s1570_s23 + $0x80] sm:$0xff] %v802_v26  ;;  %898 = vst [vmem:[%s1570_s23 + $0x180] sm:$0xff] %v834_v11  ;;  %v803_v30 = vmax.f32 %v646_v27, 0.0  ;;  %v835_v31 = vmax.f32 %v742_v28, 0.0  ;;  %v650_v32 = vadd.f32 %v649_v29, %v1553_v13  ;;  %v746_v33 = vadd.f32 %v745_v8, %v393_v25  ;;  %v418_v29 = vpop.permute.xlu0 %417 }
 0x104   : > { %v651_v34 = vpop.f32.mrf.mxu0  ;;  %v747_v35 = vpop.f32.mrf.mxu1 }
 0x105   : > { %867 = vst [vmem:[%s1570_s23 + $0x88] sm:$0xff] %v803_v30  ;;  %899 = vst [vmem:[%s1570_s23 + $0x188] sm:$0xff] %v835_v31  ;;  %v804_v37 = vmax.f32 %v650_v32, 0.0  ;;  %v836_v12 = vmax.f32 %v746_v33, 0.0  ;;  %v652_v38 = vadd.f32 %v651_v34, %v1553_v13  ;;  %v748_v39 = vadd.f32 %v747_v35, %v393_v25 }
 0x106   : > { %v655_v40 = vpop.f32.mrf.mxu0  ;;  %v751_v41 = vpop.f32.mrf.mxu1 }
 0x107   : > { %868 = vst [vmem:[%s1570_s23 + $0x90] sm:$0xff] %v804_v37  ;;  %900 = vst [vmem:[%s1570_s23 + $0x190] sm:$0xff] %v836_v12  ;;  %v805_v0 = vmax.f32 %v652_v38, 0.0  ;;  %v837_v42 = vmax.f32 %v748_v39, 0.0  ;;  %v656_v43 = vadd.f32 %v655_v40, %v1555_v14  ;;  %v752_v44 = vadd.f32 %v751_v41, %v398_v36  ;;  %v423_v39 = vpop.permute.xlu1 %422 }
 0x108   : > { %v657_v45 = vpop.f32.mrf.mxu0  ;;  %v753_v46 = vpop.f32.mrf.mxu1 }
 0x109   : > { %869 = vst [vmem:[%s1570_s23 + $0x98] sm:$0xff] %v805_v0  ;;  %901 = vst [vmem:[%s1570_s23 + $0x198] sm:$0xff] %v837_v42  ;;  %v806_v48 = vmax.f32 %v656_v43, 0.0  ;;  %v838_v13 = vmax.f32 %v752_v44, 0.0  ;;  %v658_v49 = vadd.f32 %v657_v45, %v1555_v14  ;;  %v754_v50 = vadd.f32 %v753_v46, %v398_v36 }
 0x10a   : > { %v661_v51 = vpop.f32.mrf.mxu0  ;;  %v757_v52 = vpop.f32.mrf.mxu1 }
 0x10b   : > { %870 = vst [vmem:[%s1570_s23 + $0xa0] sm:$0xff] %v806_v48  ;;  %902 = vst [vmem:[%s1570_s23 + $0x1a0] sm:$0xff] %v838_v13  ;;  %v807_v53 = vmax.f32 %v658_v49, 0.0  ;;  %v839_v9 = vmax.f32 %v754_v50, 0.0  ;;  %v662_v54 = vadd.f32 %v661_v51, %v1557_v15  ;;  %v758_v55 = vadd.f32 %v757_v52, %v403_v47 }
 0x10c   : > { %v663_v56 = vpop.f32.mrf.mxu0  ;;  %v759_v57 = vpop.f32.mrf.mxu1 }
 0x10d   : > { %871 = vst [vmem:[%s1570_s23 + $0xa8] sm:$0xff] %v807_v53  ;;  %903 = vst [vmem:[%s1570_s23 + $0x1a8] sm:$0xff] %v839_v9  ;;  %v808_v59 = vmax.f32 %v662_v54, 0.0  ;;  %v840_v14 = vmax.f32 %v758_v55, 0.0  ;;  %v664_v60 = vadd.f32 %v663_v56, %v1557_v15  ;;  %v760_v61 = vadd.f32 %v759_v57, %v403_v47 }
 0x10e   : > { %v667_v62 = vpop.f32.mrf.mxu0  ;;  %v763_v63 = vpop.f32.mrf.mxu1 }
 0x10f   : > { %872 = vst [vmem:[%s1570_s23 + $0xb0] sm:$0xff] %v808_v59  ;;  %904 = vst [vmem:[%s1570_s23 + $0x1b0] sm:$0xff] %v840_v14  ;;  %v809_v1 = vmax.f32 %v664_v60, 0.0  ;;  %v841_v2 = vmax.f32 %v760_v61, 0.0  ;;  %v668_v10 = vadd.f32 %v667_v62, %v1559_v16  ;;  %v764_v3 = vadd.f32 %v763_v63, %v408_v58 }
 0x110   : > { %v669_v4 = vpop.f32.mrf.mxu0  ;;  %v765_v5 = vpop.f32.mrf.mxu1 }
 0x111   : > { %873 = vst [vmem:[%s1570_s23 + $0xb8] sm:$0xff] %v809_v1  ;;  %905 = vst [vmem:[%s1570_s23 + $0x1b8] sm:$0xff] %v841_v2  ;;  %v810_v7 = vmax.f32 %v668_v10, 0.0  ;;  %v842_v15 = vmax.f32 %v764_v3, 0.0  ;;  %v670_v20 = vadd.f32 %v669_v4, %v1559_v16  ;;  %v766_v21 = vadd.f32 %v765_v5, %v408_v58 }
 0x112   : > { %v673_v22 = vpop.f32.mrf.mxu0  ;;  %v769_v23 = vpop.f32.mrf.mxu1 }
 0x113   : > { %874 = vst [vmem:[%s1570_s23 + $0xc0] sm:$0xff] %v810_v7  ;;  %906 = vst [vmem:[%s1570_s23 + $0x1c0] sm:$0xff] %v842_v15  ;;  %v811_v24 = vmax.f32 %v670_v20, 0.0  ;;  %v843_v25 = vmax.f32 %v766_v21, 0.0  ;;  %v674_v26 = vadd.f32 %v673_v22, %v1561_v17  ;;  %v770_v11 = vadd.f32 %v769_v23, %v413_v6 }
 0x114   : > { %v675_v27 = vpop.f32.mrf.mxu0  ;;  %v771_v28 = vpop.f32.mrf.mxu1 }
 0x115   : > { %875 = vst [vmem:[%s1570_s23 + $0xc8] sm:$0xff] %v811_v24  ;;  %907 = vst [vmem:[%s1570_s23 + $0x1c8] sm:$0xff] %v843_v25  ;;  %v812_v8 = vmax.f32 %v674_v26, 0.0  ;;  %v844_v16 = vmax.f32 %v770_v11, 0.0  ;;  %v676_v30 = vadd.f32 %v675_v27, %v1561_v17  ;;  %v772_v31 = vadd.f32 %v771_v28, %v413_v6 }
 0x116   : > { %v679_v32 = vpop.f32.mrf.mxu0  ;;  %v775_v33 = vpop.f32.mrf.mxu1 }
 0x117   : > { %876 = vst [vmem:[%s1570_s23 + $0xd0] sm:$0xff] %v812_v8  ;;  %908 = vst [vmem:[%s1570_s23 + $0x1d0] sm:$0xff] %v844_v16  ;;  %v813_v34 = vmax.f32 %v676_v30, 0.0  ;;  %v845_v35 = vmax.f32 %v772_v31, 0.0  ;;  %v680_v36 = vadd.f32 %v679_v32, %v1563_v18  ;;  %v776_v37 = vadd.f32 %v775_v33, %v418_v29 }
 0x118   : > { %v681_v12 = vpop.f32.mrf.mxu0  ;;  %v777_v38 = vpop.f32.mrf.mxu1 }
 0x119   : > { %877 = vst [vmem:[%s1570_s23 + $0xd8] sm:$0xff] %v813_v34  ;;  %909 = vst [vmem:[%s1570_s23 + $0x1d8] sm:$0xff] %v845_v35  ;;  %v814_v17 = vmax.f32 %v680_v36, 0.0  ;;  %v846_v40 = vmax.f32 %v776_v37, 0.0  ;;  %v682_v41 = vadd.f32 %v681_v12, %v1563_v18  ;;  %v778_v0 = vadd.f32 %v777_v38, %v418_v29 }
 0x11a   : > { %v685_v42 = vpop.f32.mrf.mxu0  ;;  %v781_v43 = vpop.f32.mrf.mxu1 }
 0x11b   : > { %878 = vst [vmem:[%s1570_s23 + $0xe0] sm:$0xff] %v814_v17  ;;  %910 = vst [vmem:[%s1570_s23 + $0x1e0] sm:$0xff] %v846_v40  ;;  %v815_v44 = vmax.f32 %v682_v41, 0.0  ;;  %v847_v45 = vmax.f32 %v778_v0, 0.0  ;;  %v686_v46 = vadd.f32 %v685_v42, %v1566_v19  ;;  %v782_v47 = vadd.f32 %v781_v43, %v423_v39 }
 0x11c   : > { %v687_v48 = vpop.f32.mrf.mxu0  ;;  %v783_v13 = vpop.f32.mrf.mxu1 }
 0x11d   : > { %879 = vst [vmem:[%s1570_s23 + $0xe8] sm:$0xff] %v815_v44  ;;  %911 = vst [vmem:[%s1570_s23 + $0x1e8] sm:$0xff] %v847_v45  ;;  %v816_v18 = vmax.f32 %v686_v46, 0.0  ;;  %v848_v49 = vmax.f32 %v782_v47, 0.0  ;;  %v688_v50 = vadd.f32 %v687_v48, %v1566_v19  ;;  %v784_v51 = vadd.f32 %v783_v13, %v423_v39 }
 0x11f   : > { %880 = vst [vmem:[%s1570_s23 + $0xf0] sm:$0xff] %v816_v18  ;;  %912 = vst [vmem:[%s1570_s23 + $0x1f0] sm:$0xff] %v848_v49  ;;  %v817_v52 = vmax.f32 %v688_v50, 0.0  ;;  %v849_v53 = vmax.f32 %v784_v51, 0.0 }
 0x121   : > { %881 = vst [vmem:[%s1570_s23 + $0xf8] sm:$0xff] %v817_v52  ;;  %913 = vst [vmem:[%s1570_s23 + $0x1f8] sm:$0xff] %v849_v53 }
 0x122   : > { %1135 = shalt.err (!%p1132_p5)
}
 0x123   : > { %s1136_s8 = scalar_lea.hbm %s1663_s30, 8192  ;;  %s1140_s11 = scalar_lea.hbm %s1721_s3, 16384 }
 0x124   : > { %p1137_p6 = scmp.ne.s32.totalorder %s1663_s30, %s1136_s8  ;;  %p1141_p10 = scmp.lt.s32.totalorder %s1663_s30, %s1721_s3 }
 0x125   : > { %p1142_p11 = scmp.lt.s32.totalorder %s1140_s11, %s1136_s8 }
 0x126   : > { %p1138_p7 = pnand %p1137_p6, %p1265_p4 }
 0x127   : > { %p1143_p12 = por %p1142_p11, %p1141_p10 }
 0x128   : > { %p1139_p9 = pneg %p1138_p7 }
 0x12a   : > { %p1144_p13 = pnand %p1143_p12, %p1139_p9 }
 0x12c   : > { %1147 = shalt.err (!%p1144_p13)
}
 0x12d   : > { %s1203_s21 = smov 256   ;;  %s1204_s23 = smov 16  }
 0x12e   : > { %1060 = dma.vmem_to_hbm [thread:$0]  (%p1265_p4), %s1665_s27, 8192, %s1663_s30, %s1673_s15, %s1203_s21, %s1203_s21, %s1204_s23  }
 0x12f PF: > { %p1066_p0 = scmp.ge.s32.totalorder %s1198_s17, 2  ;;  %s945_s26 = sand.u32 1, %s1178_s12  }
 0x130   : > { %s946_s28 = scalar_lea.sflag [#allocation3], %s945_s26 }
 0x131   : > { %p1063_p1 = pnand %p1066_p0, %p1272_p8 }
 0x133   : > { %p1064_p2 = pneg %p1063_p1 }
 0x135   : > { %1173 = dma.done.wait (%p1064_p2), %s946_s28, 8192  }
 0x136   : > { %1175 = vsyncadd (%p1064_p2), %s946_s28, 4294959104  ;;  %s16_s17 = sadd.s32 1, %s1198_s17   ;;  %s1724_s12 = smov %s1182_s13 }
 0x137   : > { %p13_p3 = scmp.ge.s32.totalorder %s16_s17, 4   ;;  %s1725_s13 = smov %s1186_s14 }
 0x138   : > { %s1726_s14 = smov %s1278_s25  ;;  %s1727_s15 = smov %s1194_s16 }
 0x139   : > { %s1728_s16 = smov %s1730_s20  ;;  %15 = sbr.rel (!%p13_p3) target bundleno = 4 (0x4), region = 67 }
 0x13e   :  { %951 = vsyncpa [#allocation3], 1 }
 0x13f   :  { %953 = vsyncpa [#allocation3 + $0x1], 1 }

</bundles_post_ra>
